<compile_context>
chip_gen: v7x
topology: tpu7x:2x2x1
jax: 0.10.0
libtpu: 0.0.40
codegen_flags: <defaults>
</compile_context>

<pallas_src>
import functools

import jax
import jax.numpy as jnp
from jax.experimental import pallas as pl
from jax.experimental.pallas import tpu as pltpu


_LANE = 128


def _cdiv(a, b):
    return -(-a // b)


def _sublane_pack(itemsize):
    """Rows per packed sublane group: f32 -> 8, bf16 -> 16, int8/fp8 -> 32."""
    return max(8, 8 * (4 // max(itemsize, 1)))


@functools.lru_cache(maxsize=1)
def _vmem_params():
    """(per-tile f32 budget bytes, vmem_limit_bytes), generation-aware."""
    cap = None
    try:
        cap = getattr(pltpu.get_tpu_info(), "vmem_capacity_bytes", None)
    except Exception:  # pragma: no cover - info query not available
        cap = None
    if cap is not None and cap >= 100 * 1024 * 1024:   # v5e / v6e: 128 MiB VMEM
        return 4 * 1024 * 1024, 64 * 1024 * 1024
    # v7x (64 MiB VMEM shared by 2 TCs) or unknown: stay conservative.
    return 2 * 1024 * 1024, 32 * 1024 * 1024


def _select_tiles_3d(B, S, E, itemsize, budget_bytes):
    """Pick (tS, tE) for a (B, tS, tE) block under the f32 tile budget."""
    pack = _sublane_pack(itemsize)
    # Floor: never go below a minimal (B, pack, min(E,128)) tile.
    max_elems = max(budget_bytes // 4, B * pack * min(E, _LANE))

    # Prefer full-width E: contiguous per-batch DMA chunks + unmasked wide vst.
    tE = E
    ts_fit = max_elems // max(B * tE, 1)
    if ts_fit < pack and E > _LANE:
        # Full width leaves no room for even `pack` rows: shrink E in
        # multiples of 128 so a (B, pack, tE) block fits.
        te_fit = max_elems // max(B * pack, 1)
        te_cap = (E // _LANE) * _LANE            # largest multiple of 128 <= E
        tE = min(max(_LANE, (te_fit // _LANE) * _LANE), te_cap)
        ts_fit = max_elems // max(B * tE, 1)

    if ts_fit >= S:
        tS = S
    else:
        tS = min(max(pack, (ts_fit // pack) * pack), S)
    return tS, tE


def _split_for_second_core(S, E, tS, tE, pack):
    """Guarantee >=2 grid points on a parallel axis so v7x's 2nd TC has work."""
    if _cdiv(S, tS) * _cdiv(E, tE) >= 2:
        return tS, tE
    if S > pack:
        half = _cdiv(_cdiv(S, 2), pack) * pack
        if half < S:
            return half, tE
    if tE == E and E >= 2 * _LANE and E % _LANE == 0:
        half_e = _cdiv(_cdiv(E, 2), _LANE) * _LANE
        if half_e < E:
            return tS, half_e
    return tS, tE


# --------------------------------------------------------------------------
# 3-D path: (B, S, E), per-(S, E) stats reduced over B inside each block.
# --------------------------------------------------------------------------


def _bn_kernel_3d(x_ref, gamma_ref, beta_ref, o_ref, *, eps):
    # Blocks: x/o -> (B, tS, tE); gamma/beta -> (1, 1, tE).
    x = x_ref[...].astype(jnp.float32)
    mean = jnp.mean(x, axis=0, keepdims=True)            # (1, tS, tE)
    xc = x - mean                                        # reused for var & out
    var = jnp.mean(xc * xc, axis=0, keepdims=True)       # unbiased=False
    inv_std = jax.lax.rsqrt(var + eps)                   # EUP slot
    scale = gamma_ref[...].astype(jnp.float32) * inv_std  # (1, tS, tE), cheap
    beta = beta_ref[...].astype(jnp.float32)
    o_ref[...] = (xc * scale + beta).astype(o_ref.dtype)


def _bn_3d(x, gamma, beta, eps):
    B, S, E = x.shape
    budget, vmem_limit = _vmem_params()
    itemsize = jnp.dtype(x.dtype).itemsize
    pack = _sublane_pack(itemsize)

    tS, tE = _select_tiles_3d(B, S, E, itemsize, budget)
    tS, tE = _split_for_second_core(S, E, tS, tE, pack)
    # S innermost: gamma/beta block index constant across the inner loop.
    grid = (_cdiv(E, tE), _cdiv(S, tS))

    g = gamma.reshape(1, 1, E)
    b = beta.reshape(1, 1, E)

    cost = pl.CostEstimate(
        flops=7 * B * S * E,
        transcendentals=S * E,
        bytes_accessed=2 * B * S * E * itemsize
        + 2 * E * jnp.dtype(gamma.dtype).itemsize,
    )

    return pl.pallas_call(
        functools.partial(_bn_kernel_3d, eps=eps),
        out_shape=jax.ShapeDtypeStruct((B, S, E), x.dtype),
        grid=grid,
        in_specs=[
            pl.BlockSpec((B, tS, tE), lambda e, s: (0, s, e)),
            pl.BlockSpec((1, 1, tE), lambda e, s: (0, 0, e)),
            pl.BlockSpec((1, 1, tE), lambda e, s: (0, 0, e)),
        ],
        out_specs=pl.BlockSpec((B, tS, tE), lambda e, s: (0, s, e)),
        compiler_params=pltpu.CompilerParams(
            dimension_semantics=("parallel", "parallel"),
            vmem_limit_bytes=vmem_limit,
        ),
        cost_estimate=cost,
    )(x, g, b)


# --------------------------------------------------------------------------
# 2-D path: (N, E), per-channel stats reduced over N.
# --------------------------------------------------------------------------


def _bn_kernel_2d(x_ref, gamma_ref, beta_ref, o_ref, *, eps):
    # Single-pass: N is fully resident in the block (tN == N).
    x = x_ref[...].astype(jnp.float32)
    mean = jnp.mean(x, axis=0, keepdims=True)             # (1, tE)
    xc = x - mean
    var = jnp.mean(xc * xc, axis=0, keepdims=True)        # unbiased=False
    inv_std = jax.lax.rsqrt(var + eps)
    scale = gamma_ref[...].astype(jnp.float32) * inv_std
    o_ref[...] = (xc * scale + beta_ref[...].astype(jnp.float32)).astype(o_ref.dtype)


def _stats_2d_kernel(x_ref, mean_ref, var_ref, *, n_total, block_n):
    # grid = (E_tiles, N_tiles); N innermost ("arbitrary"), outputs resident.
    n = pl.program_id(1)

    @pl.when(n == 0)
    def _():
        mean_ref[...] = jnp.zeros_like(mean_ref)   # running sum
        var_ref[...] = jnp.zeros_like(var_ref)     # running sum of squares

    x = x_ref[...].astype(jnp.float32)             # (tN, tE)
    row = jax.lax.broadcasted_iota(jnp.int32, x.shape, 0) + n * block_n
    xm = jnp.where(row < n_total, x, 0.0)          # mask padded tail rows
    mean_ref[...] += jnp.sum(xm, axis=0, keepdims=True)
    var_ref[...] += jnp.sum(xm * xm, axis=0, keepdims=True)

    @pl.when(n == pl.num_programs(1) - 1)
    def _():
        inv_n = jnp.float32(1.0 / n_total)
        m = mean_ref[...] * inv_n
        mean_ref[...] = m
        var_ref[...] = var_ref[...] * inv_n - m * m    # population variance


def _norm_2d_kernel(x_ref, mean_ref, var_ref, gamma_ref, beta_ref, o_ref, *, eps):
    inv_std = jax.lax.rsqrt(var_ref[...] + eps)                   # (1, tE)
    scale = gamma_ref[...].astype(jnp.float32) * inv_std
    shift = beta_ref[...].astype(jnp.float32) - mean_ref[...] * scale
    x = x_ref[...].astype(jnp.float32)
    o_ref[...] = (x * scale + shift).astype(o_ref.dtype)


def _bn_2d_single(x, gamma, beta, eps, tE, vmem_limit):
    N, E = x.shape
    # Give v7x's second TensorCore work when E allows it.
    if _cdiv(E, tE) < 2 and tE == E and E >= 2 * _LANE and E % _LANE == 0:
        tE = _cdiv(_cdiv(E, 2), _LANE) * _LANE
    grid = (_cdiv(E, tE),)

    g = gamma.reshape(1, E)
    b = beta.reshape(1, E)
    itemsize = jnp.dtype(x.dtype).itemsize
    cost = pl.CostEstimate(
        flops=7 * N * E,
        transcendentals=E,
        bytes_accessed=2 * N * E * itemsize + 2 * E * 4,
    )
    return pl.pallas_call(
        functools.partial(_bn_kernel_2d, eps=eps),
        out_shape=jax.ShapeDtypeStruct((N, E), x.dtype),
        grid=grid,
        in_specs=[
            pl.BlockSpec((N, tE), lambda e: (0, e)),
            pl.BlockSpec((1, tE), lambda e: (0, e)),
            pl.BlockSpec((1, tE), lambda e: (0, e)),
        ],
        out_specs=pl.BlockSpec((N, tE), lambda e: (0, e)),
        compiler_params=pltpu.CompilerParams(
            dimension_semantics=("parallel",),
            vmem_limit_bytes=vmem_limit,
        ),
        cost_estimate=cost,
    )(x, g, b)


def _bn_2d_two_pass(x, gamma, beta, eps, budget, vmem_limit, pack):
    N, E = x.shape
    max_elems = max(budget // 4, pack * min(E, _LANE))

    # Tile E first (full width preferred), then N under the budget.
    if pack * E <= max_elems or E <= _LANE:
        tE = E
    else:
        te_cap = (E // _LANE) * _LANE
        tE = min(max(_LANE, (max_elems // pack // _LANE) * _LANE), te_cap)
    tn_fit = max_elems // max(tE, 1)
    tN = N if tn_fit >= N else min(max(pack, (tn_fit // pack) * pack), N)
    grid = (_cdiv(E, tE), _cdiv(N, tN))

    g = gamma.reshape(1, E)
    b = beta.reshape(1, E)
    itemsize = jnp.dtype(x.dtype).itemsize

    # Pass 1: per-channel sum / sum-of-squares accumulated across the
    # innermost ("arbitrary") N axis, finalized to mean / population variance.
    mean, var = pl.pallas_call(
        functools.partial(_stats_2d_kernel, n_total=N, block_n=tN),
        out_shape=(
            jax.ShapeDtypeStruct((1, E), jnp.float32),
            jax.ShapeDtypeStruct((1, E), jnp.float32),
        ),
        grid=grid,
        in_specs=[pl.BlockSpec((tN, tE), lambda e, n: (n, e))],
        out_specs=(
            pl.BlockSpec((1, tE), lambda e, n: (0, e)),
            pl.BlockSpec((1, tE), lambda e, n: (0, e)),
        ),
        compiler_params=pltpu.CompilerParams(
            dimension_semantics=("parallel", "arbitrary"),
            vmem_limit_bytes=vmem_limit,
        ),
        cost_estimate=pl.CostEstimate(
            flops=3 * N * E, transcendentals=0,
            bytes_accessed=N * E * itemsize + 8 * E,
        ),
    )(x)

    # Pass 2: streamed normalization; mean/var/gamma/beta blocks stay resident
    # across the innermost N axis (constant block index).
    return pl.pallas_call(
        functools.partial(_norm_2d_kernel, eps=eps),
        out_shape=jax.ShapeDtypeStruct((N, E), x.dtype),
        grid=grid,
        in_specs=[
            pl.BlockSpec((tN, tE), lambda e, n: (n, e)),
            pl.BlockSpec((1, tE), lambda e, n: (0, e)),
            pl.BlockSpec((1, tE), lambda e, n: (0, e)),
            pl.BlockSpec((1, tE), lambda e, n: (0, e)),
            pl.BlockSpec((1, tE), lambda e, n: (0, e)),
        ],
        out_specs=pl.BlockSpec((tN, tE), lambda e, n: (n, e)),
        compiler_params=pltpu.CompilerParams(
            dimension_semantics=("parallel", "parallel"),
            vmem_limit_bytes=vmem_limit,
        ),
        cost_estimate=pl.CostEstimate(
            flops=2 * N * E, transcendentals=E,
            bytes_accessed=2 * N * E * itemsize + 16 * E,
        ),
    )(x, mean, var, g, b)


def _bn_2d(x, gamma, beta, eps, budget_bytes=None):
    N, E = x.shape
    default_budget, vmem_limit = _vmem_params()
    budget = default_budget if budget_bytes is None else budget_bytes
    itemsize = jnp.dtype(x.dtype).itemsize
    pack = _sublane_pack(itemsize)
    max_elems = budget // 4

    # Single-pass kernel (N resident in one block) when it fits the budget.
    tE = None
    if N * E <= max_elems:
        tE = E
    elif E > _LANE:
        te_fit = (max_elems // max(N, 1) // _LANE) * _LANE
        if te_fit >= _LANE:
            tE = min(te_fit, (E // _LANE) * _LANE)
    if tE is not None:
        return _bn_2d_single(x, gamma, beta, eps, tE, vmem_limit)
    return _bn_2d_two_pass(x, gamma, beta, eps, budget, vmem_limit, pack)


# --------------------------------------------------------------------------
# Public wrapper + reference + self-test.
# --------------------------------------------------------------------------


def batchnorm_with_patching(x, gamma, beta, eps=1e-6):
    """Training-mode forward of BatchNormWithPatching for (B, S, E) or (N, E)."""
    if x.ndim == 2:
        return _bn_2d(x, gamma, beta, eps)
    assert x.ndim == 3, "expected (B, S, E) or (N, E) input"
    return _bn_3d(x, gamma, beta, eps)


def _reference(x, gamma, beta, eps=1e-6):
    mean = jnp.mean(x, axis=0, keepdims=True)
    var = jnp.mean((x - mean) ** 2, axis=0, keepdims=True)
    return gamma * (x - mean) / jnp.sqrt(var + eps) + beta


if __name__ == "__main__":
    key = jax.random.PRNGKey(0)
    B, S, E = 2, 8, 32  # batch=2, seq=8, embed=32

    x = jax.random.normal(key, (B, S, E), dtype=jnp.float32)
    # Parameter init matching nn.Parameter(torch.ones/zeros(embed_size)).
    gamma = jnp.ones((E,), dtype=jnp.float32)
    beta = jnp.zeros((E,), dtype=jnp.float32)

    out = jax.block_until_ready(batchnorm_with_patching(x, gamma, beta, eps=1e-6))
    ref = _reference(x, gamma, beta, eps=1e-6)
    assert out.shape == (B, S, E)
    assert jnp.allclose(out, ref, atol=1e-5, rtol=1e-5), "3D mismatch vs reference"

    # Non-trivial affine params (deterministic) to exercise the gamma/beta path.
    kg, kb = jax.random.split(jax.random.PRNGKey(1))
    gamma2 = jax.random.normal(kg, (E,), dtype=jnp.float32)
    beta2 = jax.random.normal(kb, (E,), dtype=jnp.float32)
    out_a = jax.block_until_ready(batchnorm_with_patching(x, gamma2, beta2, eps=1e-6))
    ref_a = _reference(x, gamma2, beta2, eps=1e-6)
    assert jnp.allclose(out_a, ref_a, atol=1e-5, rtol=1e-5), "3D affine mismatch"

    # 2-D (N, E) single-pass path.
    x2 = jax.random.normal(jax.random.PRNGKey(2), (16, E), dtype=jnp.float32)
    out2 = jax.block_until_ready(batchnorm_with_patching(x2, gamma2, beta2, eps=1e-6))
    ref2 = _reference(x2, gamma2, beta2, eps=1e-6)
    assert out2.shape == (16, E)
    assert jnp.allclose(out2, ref2, atol=1e-5, rtol=1e-5), "2D mismatch vs reference"

    # 2-D two-pass (large-N) path, forced with a tiny budget so it is
    # exercised at small test shapes (N=40 also covers the masked ragged tail).
    x3 = jax.random.normal(jax.random.PRNGKey(3), (40, E), dtype=jnp.float32)
    out3 = jax.block_until_ready(_bn_2d(x3, gamma2, beta2, 1e-6, budget_bytes=4096))
    ref3 = _reference(x3, gamma2, beta2, eps=1e-6)
    assert jnp.allclose(out3, ref3, atol=1e-5, rtol=1e-5), "2D two-pass mismatch"

    print("KERNEL_OK")
</pallas_src>

<mosaic_0001>
module attributes {stable_mosaic.version = 11 : i64} {
  func.func @_bn_kernel_3d(%arg0: i32, %arg1: i32, %arg2: memref<2x8x32xf32, #tpu.memory_space<vmem>>, %arg3: memref<1x1x32xf32, #tpu.memory_space<vmem>>, %arg4: memref<1x1x32xf32, #tpu.memory_space<vmem>>, %arg5: memref<2x8x32xf32, #tpu.memory_space<vmem>>) attributes {dimension_semantics = [#tpu.dimension_semantics<parallel>, #tpu.dimension_semantics<parallel>], iteration_bounds = array<i64: 1, 1>, scalar_prefetch = 0 : i64, scratch_operands = 0 : i64, tpu.core_type = #tpu.core_type<tc>, window_params = [{transform_indices = @transform_0, window_bounds = array<i64: 2, 8, 32>}, {transform_indices = @transform_1, window_bounds = array<i64: 1, 1, 32>}, {transform_indices = @transform_2, window_bounds = array<i64: 1, 1, 32>}, {transform_indices = @transform_3, window_bounds = array<i64: 2, 8, 32>}]} {
    %c0 = arith.constant 0 : index
    %c0_0 = arith.constant 0 : index
    %c0_1 = arith.constant 0 : index
    %0 = vector.load %arg2[%c0, %c0_0, %c0_1] : memref<2x8x32xf32, #tpu.memory_space<vmem>>, vector<2x8x32xf32>
    %cst = arith.constant dense<0.000000e+00> : vector<8x32xf32>
    %1 = vector.multi_reduction <add>, %0, %cst [0] : vector<2x8x32xf32> to vector<8x32xf32>
    %2 = vector.shape_cast %1 : vector<8x32xf32> to vector<1x8x32xf32>
    %cst_2 = arith.constant 2.000000e+00 : f32
    %3 = vector.broadcast %cst_2 : f32 to vector<1x8x32xf32>
    %4 = arith.divf %2, %3 : vector<1x8x32xf32>
    %5 = vector.broadcast %4 : vector<1x8x32xf32> to vector<2x8x32xf32>
    %6 = arith.subf %0, %5 : vector<2x8x32xf32>
    %7 = arith.mulf %6, %6 : vector<2x8x32xf32>
    %cst_3 = arith.constant dense<0.000000e+00> : vector<8x32xf32>
    %8 = vector.multi_reduction <add>, %7, %cst_3 [0] : vector<2x8x32xf32> to vector<8x32xf32>
    %9 = vector.shape_cast %8 : vector<8x32xf32> to vector<1x8x32xf32>
    %cst_4 = arith.constant 2.000000e+00 : f32
    %10 = vector.broadcast %cst_4 : f32 to vector<1x8x32xf32>
    %11 = arith.divf %9, %10 : vector<1x8x32xf32>
    %cst_5 = arith.constant 9.99999997E-7 : f32
    %12 = vector.broadcast %cst_5 : f32 to vector<1x8x32xf32>
    %13 = arith.addf %11, %12 : vector<1x8x32xf32>
    %14 = math.rsqrt %13 : vector<1x8x32xf32>
    %c0_6 = arith.constant 0 : index
    %c0_7 = arith.constant 0 : index
    %c0_8 = arith.constant 0 : index
    %15 = vector.load %arg3[%c0_6, %c0_7, %c0_8] : memref<1x1x32xf32, #tpu.memory_space<vmem>>, vector<1x1x32xf32>
    %16 = vector.broadcast %15 : vector<1x1x32xf32> to vector<1x8x32xf32>
    %17 = arith.mulf %16, %14 : vector<1x8x32xf32>
    %c0_9 = arith.constant 0 : index
    %c0_10 = arith.constant 0 : index
    %c0_11 = arith.constant 0 : index
    %18 = vector.load %arg4[%c0_9, %c0_10, %c0_11] : memref<1x1x32xf32, #tpu.memory_space<vmem>>, vector<1x1x32xf32>
    %19 = vector.broadcast %17 : vector<1x8x32xf32> to vector<2x8x32xf32>
    %20 = arith.mulf %6, %19 : vector<2x8x32xf32>
    %21 = vector.broadcast %18 : vector<1x1x32xf32> to vector<2x8x32xf32>
    %22 = arith.addf %20, %21 : vector<2x8x32xf32>
    %c0_12 = arith.constant 0 : index
    %c0_13 = arith.constant 0 : index
    %c0_14 = arith.constant 0 : index
    %23 = vector.load %arg5[%c0_12, %c0_13, %c0_14] : memref<2x8x32xf32, #tpu.memory_space<vmem>>, vector<2x8x32xf32>
    tpu.vector_store %arg5[%c0_12, %c0_13, %c0_14], %22 {strides = array<i32>} : memref<2x8x32xf32, #tpu.memory_space<vmem>>, vector<2x8x32xf32>,
    return
  }
  func.func @transform_0(%arg0: i32, %arg1: i32) -> (i32, i32, i32) {
    %c0_i32 = arith.constant 0 : i32
    %c0_i32_0 = arith.constant 0 : i32
    return %c0_i32, %arg1, %arg0 : i32, i32, i32
  }
  func.func @transform_1(%arg0: i32, %arg1: i32) -> (i32, i32, i32) {
    %c0_i32 = arith.constant 0 : i32
    %c0_i32_0 = arith.constant 0 : i32
    %c0_i32_1 = arith.constant 0 : i32
    return %c0_i32, %c0_i32_0, %arg0 : i32, i32, i32
  }
  func.func @transform_2(%arg0: i32, %arg1: i32) -> (i32, i32, i32) {
    %c0_i32 = arith.constant 0 : i32
    %c0_i32_0 = arith.constant 0 : i32
    %c0_i32_1 = arith.constant 0 : i32
    return %c0_i32, %c0_i32_0, %arg0 : i32, i32, i32
  }
  func.func @transform_3(%arg0: i32, %arg1: i32) -> (i32, i32, i32) {
    %c0_i32 = arith.constant 0 : i32
    %c0_i32_0 = arith.constant 0 : i32
    return %c0_i32, %arg1, %arg0 : i32, i32, i32
  }
}

</mosaic_0001>

<bundles_post_ra>
// kernel: tpu_custom_call.1
= control target key start
LH: loop header
LB: loop body
LE: loop exit
PB: predicated region body
PF: predicated region fallthrough
CT: control target
= control target key end

     0   :  { %8 = vsyncpa [#allocation3], 0  ;;  %s207_s0 = inlined_call_operand.hbm [shape: f32[2,8,32], index: 0, kind: input, shape index: {}]   ;;  %s208_s1 = inlined_call_operand.vmem [shape: f32[1,1,32], index: 1, kind: input, shape index: {}]   ;;  %s209_s2 = inlined_call_operand.vmem [shape: f32[1,1,32], index: 2, kind: input, shape index: {}]   ;;  %s210_s3 = inlined_call_operand.hbm [shape: f32[2,8,32], index: 3, kind: output, shape index: {}]  }
   0x1   :  { %9 = vsyncpa [#allocation4], 0  ;;  %s141_s12 = smov [#allocation2]   ;;  %s93_s16 = scalar_lea.hbm %s207_s0, 256 }
   0x2   :  { %s15_s13 = sshll.u32 %s141_s12, 4  ;;  %p94_p0 = scmp.ne.s32.totalorder %s207_s0, %s93_s16  ;;  %s16_s13 = int_to_ptr.vmem [resolvable:$true] %s15_s13 }
   0x3   :  { %p97_p1 = scmp.lt.u32.totalorder %s93_s16, %s207_s0 }
   0x5   :  { %p99_p2 = pnand %p97_p1, %p94_p0 }
   0x7   :  { %102 = shalt.err (!%p99_p2)
}
   0x8   :  { %s103_s21 = scalar_lea.vmem %s16_s13, 256  ;;  %p108_p4 = scmp.lt.s32.totalorder %s16_s13, %s16_s13 }
   0x9   :  { %p104_p3 = scmp.ne.s32.totalorder %s16_s13, %s103_s21  ;;  %p109_p5 = scmp.lt.s32.totalorder %s103_s21, %s103_s21 }
   0xb   :  { %p110_p6 = por %p109_p5, %p108_p4 }
   0xd   :  { %p111_p7 = pnand %p110_p6, %p104_p3 }
   0xf   :  { %114 = shalt.err (!%p111_p7)
}
  0x10   :  { %s142_s22 = smov 128   ;;  %s143_s23 = smov 8  }
  0x11   :  { %21 = dma.hbm_to_vmem [thread:$0]  %s207_s0, 256, %s16_s13, [#allocation3], %s142_s22, %s142_s22, %s143_s23  }
  0x12   :  { %137 = dma.done.wait [#allocation3], 256  }
  0x13   :  { %138 = vsyncadd [#allocation3], 4294967040  ;;  %vm31_vm0 = vcmask 261120   ;;  %v29_v0 = vld [vmem:[#allocation2] sm:$0xff]  ;;  %v30_v1 = vld [vmem:[#allocation2 + $0x8] sm:$0xff]  ;;  %s144_s29 = smov [#allocation5]  }
  0x14   :  { %v32_v2 = vsel %vm31_vm0, %v29_v0, 0.0  ;;  %v33_v3 = vsel %vm31_vm0, %v30_v1, 0.0  ;;  %v85_v15 = vld [vmem:[%s208_s1] ss:$0 sm:$0xff]  ;;  %s73_s30 = sshll.u32 %s144_s29, 4  ;;  %s74_s30 = int_to_ptr.vmem [resolvable:$true] %s73_s30 }
  0x15   :  { %v34_v4 = vadd.f32 %v33_v3, %v32_v2  ;;  %v86_v18 = vld [vmem:[%s209_s2] ss:$0 sm:$0xff]  ;;  %s115_s4 = scalar_lea.vmem %s74_s30, 256  ;;  %p120_p9 = scmp.lt.s32.totalorder %s74_s30, %s74_s30 }
  0x16   :  { %p116_p8 = scmp.ne.s32.totalorder %s74_s30, %s115_s4  ;;  %p121_p10 = scmp.lt.s32.totalorder %s115_s4, %s115_s4 }
  0x17   :  { %v36_v5 = vmul.f32 0.5, %v34_v4 }
  0x18   :  { %p122_p11 = por %p121_p10, %p120_p9 }
  0x19   :  { %v37_v6 = vsub.f32 %v29_v0, %v36_v5  ;;  %v38_v7 = vsub.f32 %v30_v1, %v36_v5 }
  0x1a   :  { %p123_p12 = pnand %p122_p11, %p116_p8 }
  0x1b   :  { %v39_v8 = vmul.f32 %v37_v6, %v37_v6  ;;  %v40_v9 = vmul.f32 %v38_v7, %v38_v7 }
  0x1d   :  { %v41_v10 = vsel %vm31_vm0, %v39_v8, 0.0  ;;  %v42_v11 = vsel %vm31_vm0, %v40_v9, 0.0 }
  0x1e   :  { %v43_v12 = vadd.f32 %v42_v11, %v41_v10 }
  0x20   :  { %v44_v13 = vmul.f32 0.5, %v43_v12 }
  0x22   :  { %v45_v14 = vadd.f32 1e-06, %v44_v13 }
  0x24   :  { %91 = vrsqrt.f32 %v45_v14 }
  0x2e   :  { %v92_v16 = vpop.eup %91 }
  0x2f   :  { %v54_v17 = vmul.f32 %v92_v16, %v85_v15 }
  0x31   :  { %v56_v19 = vmul.f32 %v54_v17, %v37_v6  ;;  %v57_v20 = vmul.f32 %v54_v17, %v38_v7 }
  0x33   :  { %v64_v21 = vadd.f32 %v86_v18, %v56_v19  ;;  %v65_v22 = vadd.f32 %v86_v18, %v57_v20 }
  0x35   :  { %66 = vst.msk [vmem:[#allocation5] sm:$0xff] %vm31_vm0, %v64_v21  ;;  %67 = vst.msk [vmem:[#allocation5 + $0x8] sm:$0xff] %vm31_vm0, %v65_v22 }
  0x36   :  { %126 = shalt.err (!%p123_p12)
}
  0x37   :  { %s127_s5 = scalar_lea.hbm %s210_s3, 256 }
  0x38   :  { %p128_p13 = scmp.ne.s32.totalorder %s210_s3, %s127_s5  ;;  %p131_p0 = scmp.lt.u32.totalorder %s127_s5, %s210_s3 }
  0x3a   :  { %p133_p1 = pnand %p131_p0, %p128_p13 }
  0x3c   :  { %136 = shalt.err (!%p133_p1)
}
  0x3d   :  { %79 = dma.vmem_to_hbm [thread:$0]  %s74_s30, 256, %s210_s3, [#allocation4], %s142_s22, %s142_s22, %s143_s23  }
  0x3e   :  { %139 = dma.done.wait [#allocation4], 256  }
  0x3f   :  { %140 = vsyncadd [#allocation4], 4294967040 }
  0x40   :  { %83 = vsyncpa [#allocation3], 1 }
  0x41   :  { %84 = vsyncpa [#allocation4], 1 }

</bundles_post_ra>
